<compile_context>
chip_gen: v5e
topology: v5e:2x2
jax: 0.10.0
libtpu: 0.0.40
codegen_flags: <defaults>
</compile_context>

<pallas_src>
import jax
import jax.numpy as jnp
from jax.experimental import pallas as pl
from jax.experimental.pallas import tpu as pltpu

LANE = 128      # lane width: last dim of every block must be a multiple of this
SUBLANE = 8     # sublane: second-to-last dim multiple


def _round_up(n, m):
    return ((n + m - 1) // m) * m


def mlp_kernel(x_ref, w1_ref, b1_ref, w2_ref, b2_ref, w3_ref, b3_ref, o_ref):
    # x_ref: (TB, IN_P) bf16 ; w*_ref: bf16 ; b*_ref: (1, F_P) f32 ; o_ref: (TB, OUT_P) f32
    x = x_ref[...]
    h1 = jnp.dot(x, w1_ref[...], preferred_element_type=jnp.float32) + b1_ref[...]
    h1 = jnp.maximum(h1, 0.0)                                   # ReLU in f32
    h2 = jnp.dot(h1.astype(jnp.bfloat16), w2_ref[...],
                 preferred_element_type=jnp.float32) + b2_ref[...]
    h2 = jnp.maximum(h2, 0.0)                                   # ReLU in f32
    y = jnp.dot(h2.astype(jnp.bfloat16), w3_ref[...],
                preferred_element_type=jnp.float32) + b3_ref[...]
    o_ref[...] = y.astype(o_ref.dtype)


def mlp_forward(x, params, *, block_b=128):
    """x: (B, in_features) f32. Returns (B, out_features) f32."""
    w1, b1, w2, b2, w3, b3 = params
    B, in_f = x.shape
    h1_f, h2_f, out_f = w1.shape[1], w2.shape[1], w3.shape[1]

    # Padded (lane-dense) feature widths.
    in_p = _round_up(in_f, LANE)
    h1_p = _round_up(h1_f, LANE)
    h2_p = _round_up(h2_f, LANE)
    out_p = _round_up(out_f, LANE)

    # Batch tile: sublane-aligned, capped at block_b; pad batch to a multiple.
    tb = min(block_b, _round_up(B, SUBLANE))
    b_p = _round_up(B, tb)

    def pad2(a, rows, cols, dtype):
        out = jnp.zeros((rows, cols), dtype)
        return out.at[: a.shape[0], : a.shape[1]].set(a.astype(dtype))

    # bf16 matmul operands (halves HBM/VMEM traffic, full-rate MXU on v6e/v7x).
    x_p = pad2(x, b_p, in_p, jnp.bfloat16)
    w1_p = pad2(w1, in_p, h1_p, jnp.bfloat16)
    w2_p = pad2(w2, h1_p, h2_p, jnp.bfloat16)
    w3_p = pad2(w3, h2_p, out_p, jnp.bfloat16)
    # Biases stay f32 (bias add / ReLU done in f32).
    b1_p = pad2(b1, 1, h1_p, jnp.float32)
    b2_p = pad2(b2, 1, h2_p, jnp.float32)
    b3_p = pad2(b3, 1, out_p, jnp.float32)

    grid = (b_p // tb,)

    x_spec = pl.BlockSpec((tb, in_p), lambda i: (i, 0))
    out_spec = pl.BlockSpec((tb, out_p), lambda i: (i, 0))
    # Constant index_map -> weights/biases stay resident in VMEM across the grid.
    resident = lambda arr: pl.BlockSpec(arr.shape, lambda i: (0, 0))

    flops = 2 * b_p * (in_p * h1_p + h1_p * h2_p + h2_p * out_p)
    bytes_accessed = (
        x_p.size * 2
        + (w1_p.size + w2_p.size + w3_p.size) * 2
        + (b1_p.size + b2_p.size + b3_p.size) * 4
        + b_p * out_p * 4
    )

    y_p = pl.pallas_call(
        mlp_kernel,
        out_shape=jax.ShapeDtypeStruct((b_p, out_p), jnp.float32),
        grid=grid,
        in_specs=[
            x_spec,
            resident(w1_p), resident(b1_p),
            resident(w2_p), resident(b2_p),
            resident(w3_p), resident(b3_p),
        ],
        out_specs=out_spec,
        compiler_params=pltpu.CompilerParams(
            dimension_semantics=("parallel",),
        ),
        cost_estimate=pl.CostEstimate(
            flops=flops, transcendentals=0, bytes_accessed=bytes_accessed
        ),
    )(x_p, w1_p, b1_p, w2_p, b2_p, w3_p, b3_p)

    # Slice padded batch / lanes back to the logical output.
    return y_p[:B, :out_f]


def init_params(key, in_features=4, h1=8, h2=9, out_features=3):
    """Deterministic PyTorch-style (uniform +/- 1/sqrt(fan_in)) init, (in, out) layout."""
    ks = jax.random.split(key, 6)

    def linear(kw, kb, fan_in, fan_out):
        bound = 1.0 / jnp.sqrt(float(fan_in))
        w = jax.random.uniform(kw, (fan_in, fan_out), jnp.float32, -bound, bound)
        b = jax.random.uniform(kb, (1, fan_out), jnp.float32, -bound, bound)
        return w, b

    w1, b1 = linear(ks[0], ks[1], in_features, h1)
    w2, b2 = linear(ks[2], ks[3], h1, h2)
    w3, b3 = linear(ks[4], ks[5], h2, out_features)
    return (w1, b1, w2, b2, w3, b3)


def reference_forward_f32(x, params):
    """Pure-f32 plain-JAX reference matching the PyTorch module semantics."""
    w1, b1, w2, b2, w3, b3 = params
    h = jax.nn.relu(x @ w1 + b1)
    h = jax.nn.relu(h @ w2 + b2)
    return h @ w3 + b3


def reference_forward_bf16_ops(x, params):
    """Reference with the same bf16 operand rounding the kernel uses (f32 accumulate)."""
    w1, b1, w2, b2, w3, b3 = params
    r = lambda a: a.astype(jnp.bfloat16).astype(jnp.float32)
    h = jax.nn.relu(r(x) @ r(w1) + b1)
    h = jax.nn.relu(r(h) @ r(w2) + b2)
    return r(h) @ r(w3) + b3


if __name__ == "__main__":
    key = jax.random.PRNGKey(0)
    k_x, k_p = jax.random.split(key)

    batch = 256                       # big enough to exercise the batch grid (2 tiles of 128)
    in_features, h1, h2, out_features = 4, 8, 9, 3

    x = jax.random.normal(k_x, (batch, in_features), jnp.float32)
    params = init_params(k_p, in_features, h1, h2, out_features)

    y = mlp_forward(x, params)
    y = jax.block_until_ready(y)
    assert y.shape == (batch, out_features)

    # Tight check vs. a reference that applies the same bf16 operand rounding.
    y_ref_bf16 = reference_forward_bf16_ops(x, params)
    assert jnp.allclose(y, y_ref_bf16, atol=1e-4, rtol=1e-4), (
        float(jnp.max(jnp.abs(y - y_ref_bf16)))
    )

    # Loose semantic check vs. the pure-f32 PyTorch-equivalent reference.
    y_ref_f32 = reference_forward_f32(x, params)
    assert jnp.allclose(y, y_ref_f32, atol=5e-2, rtol=5e-2), (
        float(jnp.max(jnp.abs(y - y_ref_f32)))
    )

    print("KERNEL_OK")
</pallas_src>

<mosaic_0001>
module attributes {stable_mosaic.version = 11 : i64} {
  func.func @mlp_kernel(%arg0: i32, %arg1: memref<128x128xbf16, #tpu.memory_space<vmem>>, %arg2: memref<128x128xbf16, #tpu.memory_space<vmem>>, %arg3: memref<1x128xf32, #tpu.memory_space<vmem>>, %arg4: memref<128x128xbf16, #tpu.memory_space<vmem>>, %arg5: memref<1x128xf32, #tpu.memory_space<vmem>>, %arg6: memref<128x128xbf16, #tpu.memory_space<vmem>>, %arg7: memref<1x128xf32, #tpu.memory_space<vmem>>, %arg8: memref<128x128xf32, #tpu.memory_space<vmem>>) attributes {dimension_semantics = [#tpu.dimension_semantics<parallel>], iteration_bounds = array<i64: 2>, scalar_prefetch = 0 : i64, scratch_operands = 0 : i64, tpu.core_type = #tpu.core_type<tc>, window_params = [{transform_indices = @transform_0, window_bounds = array<i64: 128, 128>}, {pipeline_mode = #tpu.pipeline_mode<synchronous>, transform_indices = @transform_1, window_bounds = array<i64: 128, 128>}, {pipeline_mode = #tpu.pipeline_mode<synchronous>, transform_indices = @transform_2, window_bounds = array<i64: 1, 128>}, {pipeline_mode = #tpu.pipeline_mode<synchronous>, transform_indices = @transform_3, window_bounds = array<i64: 128, 128>}, {pipeline_mode = #tpu.pipeline_mode<synchronous>, transform_indices = @transform_4, window_bounds = array<i64: 1, 128>}, {pipeline_mode = #tpu.pipeline_mode<synchronous>, transform_indices = @transform_5, window_bounds = array<i64: 128, 128>}, {pipeline_mode = #tpu.pipeline_mode<synchronous>, transform_indices = @transform_6, window_bounds = array<i64: 1, 128>}, {transform_indices = @transform_7, window_bounds = array<i64: 128, 128>}]} {
    %c0 = arith.constant 0 : index
    %c0_0 = arith.constant 0 : index
    %0 = vector.load %arg1[%c0, %c0_0] : memref<128x128xbf16, #tpu.memory_space<vmem>>, vector<128x128xbf16>
    %c0_1 = arith.constant 0 : index
    %c0_2 = arith.constant 0 : index
    %1 = vector.load %arg2[%c0_1, %c0_2] : memref<128x128xbf16, #tpu.memory_space<vmem>>, vector<128x128xbf16>
    %cst = arith.constant dense<0.000000e+00> : vector<128x128xf32>
    %2 = tpu.matmul %0, %1, %cst {dimension_numbers = #tpu.dot_dimension_numbers<[1], [0], [0], [1], [0, 0, 1, 1], [], []>} : vector<128x128xbf16>, vector<128x128xbf16>, vector<128x128xf32> -> vector<128x128xf32>
    %c0_3 = arith.constant 0 : index
    %c0_4 = arith.constant 0 : index
    %3 = vector.load %arg3[%c0_3, %c0_4] : memref<1x128xf32, #tpu.memory_space<vmem>>, vector<1x128xf32>
    %4 = vector.broadcast %3 : vector<1x128xf32> to vector<128x128xf32>
    %5 = arith.addf %2, %4 : vector<128x128xf32>
    %cst_5 = arith.constant 0.000000e+00 : f32
    %6 = vector.broadcast %cst_5 : f32 to vector<128x128xf32>
    %7 = arith.maximumf %5, %6 : vector<128x128xf32>
    %8 = arith.truncf %7 : vector<128x128xf32> to vector<128x128xbf16>
    %c0_6 = arith.constant 0 : index
    %c0_7 = arith.constant 0 : index
    %9 = vector.load %arg4[%c0_6, %c0_7] : memref<128x128xbf16, #tpu.memory_space<vmem>>, vector<128x128xbf16>
    %cst_8 = arith.constant dense<0.000000e+00> : vector<128x128xf32>
    %10 = tpu.matmul %8, %9, %cst_8 {dimension_numbers = #tpu.dot_dimension_numbers<[1], [0], [0], [1], [0, 0, 1, 1], [], []>} : vector<128x128xbf16>, vector<128x128xbf16>, vector<128x128xf32> -> vector<128x128xf32>
    %c0_9 = arith.constant 0 : index
    %c0_10 = arith.constant 0 : index
    %11 = vector.load %arg5[%c0_9, %c0_10] : memref<1x128xf32, #tpu.memory_space<vmem>>, vector<1x128xf32>
    %12 = vector.broadcast %11 : vector<1x128xf32> to vector<128x128xf32>
    %13 = arith.addf %10, %12 : vector<128x128xf32>
    %cst_11 = arith.constant 0.000000e+00 : f32
    %14 = vector.broadcast %cst_11 : f32 to vector<128x128xf32>
    %15 = arith.maximumf %13, %14 : vector<128x128xf32>
    %16 = arith.truncf %15 : vector<128x128xf32> to vector<128x128xbf16>
    %c0_12 = arith.constant 0 : index
    %c0_13 = arith.constant 0 : index
    %17 = vector.load %arg6[%c0_12, %c0_13] : memref<128x128xbf16, #tpu.memory_space<vmem>>, vector<128x128xbf16>
    %cst_14 = arith.constant dense<0.000000e+00> : vector<128x128xf32>
    %18 = tpu.matmul %16, %17, %cst_14 {dimension_numbers = #tpu.dot_dimension_numbers<[1], [0], [0], [1], [0, 0, 1, 1], [], []>} : vector<128x128xbf16>, vector<128x128xbf16>, vector<128x128xf32> -> vector<128x128xf32>
    %c0_15 = arith.constant 0 : index
    %c0_16 = arith.constant 0 : index
    %19 = vector.load %arg7[%c0_15, %c0_16] : memref<1x128xf32, #tpu.memory_space<vmem>>, vector<1x128xf32>
    %20 = vector.broadcast %19 : vector<1x128xf32> to vector<128x128xf32>
    %21 = arith.addf %18, %20 : vector<128x128xf32>
    %c0_17 = arith.constant 0 : index
    %c0_18 = arith.constant 0 : index
    %22 = vector.load %arg8[%c0_17, %c0_18] : memref<128x128xf32, #tpu.memory_space<vmem>>, vector<128x128xf32>
    tpu.vector_store %arg8[%c0_17, %c0_18], %21 {strides = array<i32>} : memref<128x128xf32, #tpu.memory_space<vmem>>, vector<128x128xf32>,
    return
  }
  func.func @transform_0(%arg0: i32) -> (i32, i32) {
    %c0_i32 = arith.constant 0 : i32
    %c0_i32_0 = arith.constant 0 : i32
    return %arg0, %c0_i32 : i32, i32
  }
  func.func @transform_1(%arg0: i32) -> (i32, i32) {
    %c0_i32 = arith.constant 0 : i32
    %c0_i32_0 = arith.constant 0 : i32
    %c0_i32_1 = arith.constant 0 : i32
    return %c0_i32, %c0_i32_0 : i32, i32
  }
  func.func @transform_2(%arg0: i32) -> (i32, i32) {
    %c0_i32 = arith.constant 0 : i32
    %c0_i32_0 = arith.constant 0 : i32
    %c0_i32_1 = arith.constant 0 : i32
    return %c0_i32, %c0_i32_0 : i32, i32
  }
  func.func @transform_3(%arg0: i32) -> (i32, i32) {
    %c0_i32 = arith.constant 0 : i32
    %c0_i32_0 = arith.constant 0 : i32
    %c0_i32_1 = arith.constant 0 : i32
    return %c0_i32, %c0_i32_0 : i32, i32
  }
  func.func @transform_4(%arg0: i32) -> (i32, i32) {
    %c0_i32 = arith.constant 0 : i32
    %c0_i32_0 = arith.constant 0 : i32
    %c0_i32_1 = arith.constant 0 : i32
    return %c0_i32, %c0_i32_0 : i32, i32
  }
  func.func @transform_5(%arg0: i32) -> (i32, i32) {
    %c0_i32 = arith.constant 0 : i32
    %c0_i32_0 = arith.constant 0 : i32
    %c0_i32_1 = arith.constant 0 : i32
    return %c0_i32, %c0_i32_0 : i32, i32
  }
  func.func @transform_6(%arg0: i32) -> (i32, i32) {
    %c0_i32 = arith.constant 0 : i32
    %c0_i32_0 = arith.constant 0 : i32
    %c0_i32_1 = arith.constant 0 : i32
    return %c0_i32, %c0_i32_0 : i32, i32
  }
  func.func @transform_7(%arg0: i32) -> (i32, i32) {
    %c0_i32 = arith.constant 0 : i32
    %c0_i32_0 = arith.constant 0 : i32
    return %arg0, %c0_i32 : i32, i32
  }
}

</mosaic_0001>

<bundles_post_ra>
// kernel: tpu_custom_call.1
= control target key start
LH: loop header
LB: loop body
LE: loop exit
PB: predicated region body
PF: predicated region fallthrough
CT: control target
= control target key end

     0   :  { %s1708_s0 = inlined_call_operand.hbm [shape: bf16[256,128], index: 0, kind: input, shape index: {}]   ;;  %s1709_s1 = inlined_call_operand.hbm [shape: bf16[128,128], index: 1, kind: input, shape index: {}]   ;;  %s1710_s2 = inlined_call_operand.vmem [shape: f32[1,128], index: 2, kind: input, shape index: {}]   ;;  %s1711_s3 = inlined_call_operand.hbm [shape: bf16[128,128], index: 3, kind: input, shape index: {}]   ;;  %s1712_s4 = inlined_call_operand.vmem [shape: f32[1,128], index: 4, kind: input, shape index: {}]   ;;  %s1713_s5 = inlined_call_operand.hbm [shape: bf16[128,128], index: 5, kind: input, shape index: {}]   ;;  %s1714_s6 = inlined_call_operand.vmem [shape: f32[1,128], index: 6, kind: input, shape index: {}]   ;;  %s1715_s7 = inlined_call_operand.hbm [shape: f32[256,128], index: 7, kind: output, shape index: {}]  }
   0x1   :  { %1718 = sst [smem:[#allocation15_spill]] %s1709_s1 }
   0x2   :  { %12 = vsyncpa [#allocation3], 0 }
   0x3   :  { %14 = vsyncpa [#allocation3 + $0x1], 0 }
   0x4   :  { %15 = vsyncpa [#allocation6], 0 }
   0x5   :  { %16 = vsyncpa [#allocation9], 0 }
   0x6   :  { %17 = vsyncpa [#allocation4], 0 }
   0x7   :  { %19 = vsyncpa [#allocation4 + $0x1], 0  ;;  %s1481_s24 = smov 0   ;;  %s1483_s25 = smov 0  }
   0x8   :  { %s1485_s26 = smov 0   ;;  %s1487_s27 = smov 0  }
   0x9 LB: > { %s1502_s28 = sadd.s32 4294967295, %s1432_s27   ;;  %s948_s29 = sadd.s32 4294967294, %s1432_s27   ;;  %s1432_s27 = sphi %s1487_s27, %s1732_s27   ;;  %s1428_s26 = sphi %s1485_s26, %s1731_s26   ;;  %s1424_s25 = sphi %s1483_s25, %s1730_s25   ;;  %s1420_s24 = sphi %s1481_s24, %s1729_s24  }
   0xa   : > { %p45_p0 = scmp.ne.s32.totalorder %s1424_s25, %s1420_s24  ;;  %p46_p1 = scmp.eq.s32.totalorder %s1502_s28, 0 }
   0xb   : > { %p195_p2 = scmp.eq.s32.totalorder %s1502_s28, 1  ;;  %p201_p3 = scmp.eq.s32.totalorder %s948_s29, 1 }
   0xc   : > { %p1511_p4 = por %p46_p1, %p45_p0  ;;  %p949_p5 = scmp.ge.s32.totalorder %s1432_s27, 1 }
   0xd   : > { %p1516_p6 = por %p201_p3, %p45_p0  ;;  %p208_p7 = scmp.lt.s32.totalorder %s1432_s27, 3 }
   0xe   : > { %s1721_s1 = sld [smem:[#allocation15_spill]]  ;;  %s1434_s13 = smov [#allocation5]  }
   0xf   : > { %p1524_p8 = pnand %p949_p5, %p208_p7  ;;  %s221_s14 = sshll.u32 %s1434_s13, 4  ;;  %s222_s14 = int_to_ptr.vmem [resolvable:$true] %s221_s14 }
  0x10   : > { %s236_s18 = sshll.u32 %s1711_s3, 4  ;;  %s1716_s19 = smov 64   ;;  %s237_s18 = int_to_ptr.hbm [resolvable:$true] %s236_s18 }
  0x11   : > { %p1170_p9 = pneg %p1524_p8  ;;  %s1717_s20 = smov 4  }
  0x12   : > { %s1437_s21 = smov [#allocation7]   ;;  %s253_s9 = sshll.u32 %s1713_s5, 4  ;;  %s254_s9 = int_to_ptr.hbm [resolvable:$true] %s253_s9 }
  0x13   : > { %p1532_p10 = pnand %p1170_p9, %p46_p1  ;;  %s238_s22 = sshll.u32 %s1437_s21, 4  ;;  %s239_s22 = int_to_ptr.vmem [resolvable:$true] %s238_s22 }
  0x14   : > { %s219_s11 = sshll.u32 %s1721_s1, 4  ;;  %s1438_s10 = smov [#allocation8]   ;;  %s220_s11 = int_to_ptr.hbm [resolvable:$true] %s219_s11 }
  0x15   : > { %1173 = dma.hbm_to_vmem [thread:$0]  (!%p1532_p10), %s220_s11, 1024, %s222_s14, [#allocation6], %s1716_s19, %s1716_s19, %s1717_s20  }
  0x16   : > { %1176 = dma.hbm_to_vmem [thread:$0]  (!%p1532_p10), %s237_s18, 1024, %s239_s22, [#allocation6], %s1716_s19, %s1716_s19, %s1717_s20  }
  0x17   : > { %s255_s11 = sshll.u32 %s1438_s10, 4  ;;  %s1554_s13 = sadd.s32 1, %s1432_s27   ;;  %s256_s11 = int_to_ptr.vmem [resolvable:$true] %s255_s11 }
  0x18   : > { %1179 = dma.hbm_to_vmem [thread:$0]  (!%p1532_p10), %s254_s9, 1024, %s256_s11, [#allocation9], %s1716_s19, %s1716_s19, %s1717_s20  }
  0x19   : > { %s29_s14 = ssub.s32 %s1432_s27, %s1554_s13  ;;  %s32_s16 = sadd.s32 1, %s1428_s26 }
  0x1a   : > { %p30_p12 = scmp.eq.s32.totalorder %s29_s14, 0  ;;  %p39_p13 = scmp.ne.s32.totalorder %s1428_s26, %s1424_s25 }
  0x1b   : > { %p40_p0 = scmp.eq.s32.totalorder %s1432_s27, 0  ;;  %p1191_p5 = scmp.lt.s32.totalorder %s1432_s27, 2 }
  0x1c   : > { %s1568_s17 = scalar_select %p30_p12, %s1428_s26, %s32_s16  }
  0x1d   : > { %p1572_p3 = por %p195_p2, %p39_p13  ;;  %s272_s21 = sand.u32 1, %s1428_s26  }
  0x1e   : > { %s1096_s15 = sshll.u32 %s1432_s27, 6  ;;  %p41_p7 = por %p40_p0, %p39_p13 }
  0x1f   : > { %s954_s22 = sshll.u32 %s272_s21, 6  ;;  %s281_s9 = scalar_lea.hbm %s1708_s0, %s1096_s15 }
  0x20   : > { %s282_s10 = sshll.u32 %s281_s9, 4  ;;  %s276_s11 = scalar_lea.vmem [#allocation2], %s954_s22  ;;  %s283_s10 = int_to_ptr.hbm [resolvable:$true] %s282_s10 }
  0x21   : > { %s284_s14 = sshll.u32 %s276_s11, 4  ;;  %p1582_p9 = pnand %p1191_p5, %p41_p7  ;;  %s285_s14 = int_to_ptr.vmem [resolvable:$true] %s284_s14 }
  0x22   : > { %s273_s19 = scalar_lea.sflag [#allocation3], %s272_s21  ;;  %s1328_s20 = sshra.s32 %s283_s10, 4  ;;  %s1329_s20 = int_to_ptr.hbm [resolvable:$true] %s1328_s20 }
  0x23   : > { %s1330_s1 = scalar_lea.hbm %s1329_s20, 64  ;;  %p1332_p10 = pneg %p1582_p9 }
  0x24   : > { %p1331_p2 = scmp.ne.s32.totalorder %s1329_s20, %s1330_s1  ;;  %s1335_s22 = scalar_lea.hbm %s1708_s0, 128 }
  0x25   : > { %p1336_p0 = scmp.lt.s32.totalorder %s1329_s20, %s1708_s0  ;;  %p1337_p5 = scmp.lt.s32.totalorder %s1335_s22, %s1330_s1 }
  0x26   : > { %p1333_p12 = pnand %p1332_p10, %p1331_p2 }
  0x27   : > { %p1338_p7 = por %p1337_p5, %p1336_p0 }
  0x28   : > { %p1334_p13 = pneg %p1333_p12 }
  0x2a   : > { %p1339_p11 = pnand %p1338_p7, %p1334_p13 }
  0x2c   : > { %1342 = shalt.err (!%p1339_p11)
}
  0x2d   : > { %s1726_s21 = smov 4   ;;  %s1727_s11 = smov 64  }
  0x2e   : > { %1183 = dma.hbm_to_vmem [thread:$0]  (!%p1582_p9), %s283_s10, 1024, %s285_s14, %s273_s19, %s1727_s11, %s1727_s11, %s1726_s21  }
  0x2f   : > { %296 = sbr.rel (%p1524_p8) target bundleno = 595 (0x253), region = 48  ;;  %s1602_s15 = sand.u32 (!%p1524_p8), 1, %s1424_s25  }
  0x30   : > { %s958_s20 = sshll.u32 (!%p1524_p8), %s1602_s15, 6  ;;  %s299_s1 = scalar_lea.sflag (!%p1524_p8), [#allocation3], %s1602_s15 }
  0x31   : > { %s1606_s23 = scalar_lea.vmem (!%p1524_p8), [#allocation2], %s958_s20 }
  0x34   : > { %1403 = dma.done.wait (%p1511_p4), %s299_s1, 1024  }
  0x35   : > { %1405 = vsyncadd (%p1511_p4), %s299_s1, 4294966272 }
  0x36   : > { %1407 = dma.done.wait (%p46_p1), [#allocation6], 2048  }
  0x37   : > { %1409 = vsyncadd (%p46_p1), [#allocation6], 4294965248 }
  0x38   : > { %1411 = dma.done.wait (%p46_p1), [#allocation9], 1024  }
  0x39   : > { %1413 = vsyncadd (%p46_p1), [#allocation9], 4294966272  ;;  %v1112_v0 = vld [vmem:[#allocation5 + $0x38] sm:$0xff]  ;;  %v1111_v1 = vld [vmem:[#allocation5 + $0x30] sm:$0xff]  ;;  %s962_s14 = sshll.u32 %s1602_s15, 7  ;;  %s1129_s9 = sshll.u32 %s1502_s28, 7 }
  0x3a   : > { %483 = vmatpush.bf16.msra.mxu0 %v1112_v0  ;;  %1130 = vmatpush.bf16.msra.mxu3 %v1112_v0  ;;  %v1110_v2 = vld [vmem:[#allocation5 + $0x28] sm:$0xff]  ;;  %v1109_v3 = vld [vmem:[#allocation5 + $0x20] sm:$0xff]  ;;  %v1108_v4 = vld [vmem:[#allocation5 + $0x18] sm:$0xff]  ;;  %s1656_s29 = scalar_lea.vmem [#allocation10], %s962_s14  ;;  %s842_s20 = scalar_lea.hbm %s1715_s7, %s1129_s9 }
  0x3b   : > { %v1107_v5 = vld [vmem:[#allocation5 + $0x10] sm:$0xff]  ;;  %v1106_v6 = vld [vmem:[#allocation5 + $0x8] sm:$0xff]  ;;  %v1105_v7 = vld [vmem:[#allocation5] sm:$0xff]  ;;  %s843_s1 = sshll.u32 %s1656_s29, 4  ;;  %s831_s30 = scalar_lea.sflag [#allocation4], %s1602_s15  ;;  %s844_s1 = int_to_ptr.vmem [resolvable:$true] %s843_s1 }
  0x3c   : > { %v1097_v8 = vld [vmem:[%s1606_s23] sm:$0xff]  ;;  %v1103_v9 = vld [vmem:[%s1606_s23 + $0x30] sm:$0xff]  ;;  %v1098_v10 = vld [vmem:[%s1606_s23 + $0x8] sm:$0xff]  ;;  %s1378_s14 = scalar_lea.hbm %s1715_s7, 256 }
  0x3d   : > { %v1104_v11 = vld [vmem:[%s1606_s23 + $0x38] sm:$0xff]  ;;  %v1099_v12 = vld [vmem:[%s1606_s23 + $0x10] sm:$0xff]  ;;  %v1118_v16 = vld [vmem:[#allocation7 + $0x28] sm:$0xff] }
  0x3e   : > { %484 = vmatpush.bf16.msra.mxu0 %v1111_v1  ;;  %1131 = vmatpush.bf16.msra.mxu3 %v1111_v1  ;;  %v1100_v13 = vld [vmem:[%s1606_s23 + $0x18] sm:$0xff]  ;;  %v1119_v15 = vld [vmem:[#allocation7 + $0x30] sm:$0xff]  ;;  %v1117_v17 = vld [vmem:[#allocation7 + $0x20] sm:$0xff] }
  0x3f   : > { %v1120_v14 = vld [vmem:[#allocation7 + $0x38] sm:$0xff]  ;;  %v1101_v18 = vld [vmem:[%s1606_s23 + $0x20] sm:$0xff]  ;;  %v1102_v19 = vld [vmem:[%s1606_s23 + $0x28] sm:$0xff]  ;;  %s845_s23 = sshll.u32 %s842_s20, 4  ;;  %s846_s23 = int_to_ptr.hbm [resolvable:$true] %s845_s23 }
  0x40   : > { %624 = vmatpush.bf16.msra.mxu1 %v1120_v14  ;;  %v1116_v20 = vld [vmem:[#allocation7 + $0x18] sm:$0xff]  ;;  %v1115_v21 = vld [vmem:[#allocation7 + $0x10] sm:$0xff]  ;;  %v1114_v22 = vld [vmem:[#allocation7 + $0x8] sm:$0xff]  ;;  %s1372_s12 = sshra.s32 %s846_s23, 4  ;;  %s1373_s12 = int_to_ptr.hbm [resolvable:$true] %s1372_s12 }
  0x41   : > { %v1113_v23 = vld [vmem:[#allocation7] sm:$0xff]  ;;  %s1374_s19 = scalar_lea.hbm %s1373_s12, 128  ;;  %p1379_p11 = scmp.lt.s32.totalorder %s1373_s12, %s1715_s7 }
  0x42   : > { %485 = vmatpush.bf16.msra.mxu0 %v1110_v2  ;;  %1132 = vmatpush.bf16.msra.mxu3 %v1110_v2  ;;  %v1631_v25 = vld [vmem:[%s1710_s2] ss:$0 sm:$0xff]  ;;  %p1375_p1 = scmp.ne.s32.totalorder %s1373_s12, %s1374_s19  ;;  %p1380_p9 = scmp.lt.s32.totalorder %s1378_s14, %s1374_s19 }
  0x44   : > { %625 = vmatpush.bf16.msra.mxu1 %v1119_v15  ;;  %p1376_p4 = pnand %p1375_p1, %p1572_p3  ;;  %p1381_p2 = por %p1380_p9, %p1379_p11 }
  0x46   : > { %486 = vmatpush.bf16.msra.mxu0 %v1109_v3  ;;  %1133 = vmatpush.bf16.msra.mxu3 %v1109_v3  ;;  %v1128_v3 = vld [vmem:[#allocation8 + $0x38] sm:$0xff]  ;;  %p1377_p8 = pneg %p1376_p4 }
  0x47   : > { %765 = vmatpush.bf16.msra.mxu2 %v1128_v3 }
  0x48   : > { %626 = vmatpush.bf16.msra.mxu1 %v1118_v16  ;;  %p1382_p10 = pnand %p1381_p2, %p1377_p8 }
  0x4a   : > { %487 = vmatpush.bf16.msra.mxu0 %v1108_v4  ;;  %1134 = vmatpush.bf16.msra.mxu3 %v1108_v4 }
  0x4c   : > { %627 = vmatpush.bf16.msra.mxu1 %v1117_v17 }
  0x4e   : > { %488 = vmatpush.bf16.msra.mxu0 %v1107_v5  ;;  %1135 = vmatpush.bf16.msra.mxu3 %v1107_v5  ;;  %v1127_v5 = vld [vmem:[#allocation8 + $0x30] sm:$0xff] }
  0x4f   : > { %766 = vmatpush.bf16.msra.mxu2 %v1127_v5 }
  0x50   : > { %628 = vmatpush.bf16.msra.mxu1 %v1116_v20 }
  0x52   : > { %489 = vmatpush.bf16.msra.mxu0 %v1106_v6  ;;  %1136 = vmatpush.bf16.msra.mxu3 %v1106_v6  ;;  %v1126_v6 = vld [vmem:[#allocation8 + $0x28] sm:$0xff] }
  0x53   : > { %767 = vmatpush.bf16.msra.mxu2 %v1126_v6 }
  0x54   : > { %629 = vmatpush.bf16.msra.mxu1 %v1115_v21 }
  0x56   : > { %490 = vmatpush.bf16.msra.mxu0 %v1105_v7  ;;  %1137 = vmatpush.bf16.msra.mxu3 %v1105_v7 }
  0x58   : > { %630 = vmatpush.bf16.msra.mxu1 %v1114_v22 }
  0x59   : > { %491 = vmatmul.bf16.vlgmr.msra.gmra.mxu0 %v1097_v8  ;;  %521 = vmatmul.bf16.vlgmr.msra.gmra.mxu3 %v1103_v9 }
  0x5a   : > { %1138 = vmatpush.bf16.msrb.mxu3 %v1120_v14 }
  0x5c   : > { %631 = vmatpush.bf16.msra.mxu1 %v1113_v23 }
  0x5e   : > { %1139 = vmatpush.bf16.msrb.mxu3 %v1119_v15 }
  0x62   : > { %1140 = vmatpush.bf16.msrb.mxu3 %v1118_v16 }
  0x66   : > { %1141 = vmatpush.bf16.msrb.mxu3 %v1117_v17 }
  0x69   : > { %496 = vmatmul.bf16.gmra.mxu0 %v1098_v10  ;;  %526 = vmatmul.bf16.gmra.mxu3 %v1104_v11  ;;  %v1125_v10 = vld [vmem:[#allocation8 + $0x20] sm:$0xff] }
  0x6a   : > { %1142 = vmatpush.bf16.msrb.mxu3 %v1116_v20  ;;  %768 = vmatpush.bf16.msra.mxu2 %v1125_v10 }
  0x6e   : > { %1143 = vmatpush.bf16.msrb.mxu3 %v1115_v21  ;;  %v1124_v21 = vld [vmem:[#allocation8 + $0x18] sm:$0xff] }
  0x6f   : > { %769 = vmatpush.bf16.msra.mxu2 %v1124_v21 }
  0x72   : > { %1144 = vmatpush.bf16.msrb.mxu3 %v1114_v22  ;;  %v1123_v22 = vld [vmem:[#allocation8 + $0x10] sm:$0xff] }
  0x73   : > { %770 = vmatpush.bf16.msra.mxu2 %v1123_v22 }
  0x76   : > { %1145 = vmatpush.bf16.msrb.mxu3 %v1113_v23  ;;  %v1122_v23 = vld [vmem:[#allocation8 + $0x8] sm:$0xff] }
  0x77   : > { %771 = vmatpush.bf16.msra.mxu2 %v1122_v23 }
  0x79   : > { %501 = vmatmul.bf16.gmra.mxu0 %v1099_v12 }
  0x7a   : > { %1146 = vmatpush.bf16.msra.mxu3 %v1128_v3 }
  0x7e   : > { %1147 = vmatpush.bf16.msra.mxu3 %v1127_v5 }
  0x82   : > { %1148 = vmatpush.bf16.msra.mxu3 %v1126_v6 }
  0x86   : > { %1149 = vmatpush.bf16.msra.mxu3 %v1125_v10 }
  0x89   : > { %506 = vmatmul.bf16.gmra.mxu0 %v1100_v13 }
  0x8a   : > { %1150 = vmatpush.bf16.msra.mxu3 %v1124_v21 }
  0x8e   : > { %1151 = vmatpush.bf16.msra.mxu3 %v1123_v22 }
  0x92   : > { %1152 = vmatpush.bf16.msra.mxu3 %v1122_v23 }
  0x99   : > { %511 = vmatmul.bf16.gmra.mxu0 %v1101_v18 }
  0xa9   : > { %516 = vmatmul.bf16.gmra.mxu0 %v1102_v19 }
  0xd6   : > { %v492_v24 = vpop.f32.mrf.mxu0 }
  0xd7   : > { %v493_v27 = vadd.f32 %v1631_v25, %v492_v24  ;;  %v1121_v24 = vld [vmem:[#allocation8] sm:$0xff] }
  0xd8   : > { %772 = vmatpush.bf16.msra.mxu2 %v1121_v24  ;;  %1153 = vmatpush.bf16.msra.mxu3 %v1121_v24 }
  0xd9   : > { %v532_v30 = vmax.f32 %v493_v27, 0.0 }
  0xdc   : > { %v522_v26 = vpop.f32.mrf.mxu3 }
  0xdd   : > { %v523_v32 = vadd.f32 %v1631_v25, %v522_v26 }
  0xde   : > { %v494_v28 = vpop.f32.mrf.mxu0 }
  0xdf   : > { %v495_v29 = vadd.f32 %v1631_v25, %v494_v28  ;;  %v544_v35 = vmax.f32 %v523_v32, 0.0 }
  0xe1   : > { %v533_v31 = vmax.f32 %v495_v29, 0.0 }
  0xe3   : > { %v548_v33 = vpack.c.bf16 %v533_v31, %v532_v30 }
  0xe4   : > { %v524_v34 = vpop.f32.mrf.mxu3 }
  0xe5   : > { %632 = vmatmul.bf16.vlgmr.msra.gmra.mxu1 %v548_v33  ;;  %v525_v36 = vadd.f32 %v1631_v25, %v524_v34 }
  0xe6   : > { %v497_v37 = vpop.f32.mrf.mxu0 }
  0xe7   : > { %v545_v38 = vmax.f32 %v525_v36, 0.0  ;;  %v498_v41 = vadd.f32 %v1631_v25, %v497_v37 }
  0xe9   : > { %v554_v39 = vpack.c.bf16 %v545_v38, %v544_v35  ;;  %v534_v44 = vmax.f32 %v498_v41, 0.0 }
  0xeb   : > { %662 = vmatmul.bf16.vlgmr.msrb.gmra.mxu3 %v554_v39 }
  0xec   : > { %v527_v40 = vpop.f32.mrf.mxu3 }
  0xed   : > { %v528_v46 = vadd.f32 %v1631_v25, %v527_v40 }
  0xee   : > { %v499_v42 = vpop.f32.mrf.mxu0 }
  0xef   : > { %v500_v43 = vadd.f32 %v1631_v25, %v499_v42  ;;  %v546_v49 = vmax.f32 %v528_v46, 0.0 }
  0xf1   : > { %v535_v45 = vmax.f32 %v500_v43, 0.0 }
  0xf3   : > { %v549_v47 = vpack.c.bf16 %v535_v45, %v534_v44 }
  0xf4   : > { %v529_v48 = vpop.f32.mrf.mxu3 }
  0xf5   : > { %637 = vmatmul.bf16.gmra.mxu1 %v549_v47  ;;  %v530_v50 = vadd.f32 %v1631_v25, %v529_v48 }
  0xf6   : > { %v502_v51 = vpop.f32.mrf.mxu0 }
  0xf7   : > { %v547_v52 = vmax.f32 %v530_v50, 0.0  ;;  %v503_v54 = vadd.f32 %v1631_v25, %v502_v51 }
  0xf9   : > { %v555_v53 = vpack.c.bf16 %v547_v52, %v546_v49  ;;  %v536_v57 = vmax.f32 %v503_v54, 0.0 }
  0xfb   : > { %667 = vmatmul.bf16.gmra.mxu3 %v555_v53 }
  0xfe   : > { %v504_v55 = vpop.f32.mrf.mxu0 }
  0xff   : > { %v505_v56 = vadd.f32 %v1631_v25, %v504_v55 }
 0x101   : > { %v537_v58 = vmax.f32 %v505_v56, 0.0 }
 0x103   : > { %v550_v59 = vpack.c.bf16 %v537_v58, %v536_v57 }
 0x105   : > { %642 = vmatmul.bf16.gmra.mxu1 %v550_v59 }
 0x106   : > { %v507_v60 = vpop.f32.mrf.mxu0 }
 0x107   : > { %v508_v61 = vadd.f32 %v1631_v25, %v507_v60 }
 0x109   : > { %v538_v0 = vmax.f32 %v508_v61, 0.0 }
 0x10e   : > { %v509_v62 = vpop.f32.mrf.mxu0 }
 0x10f   : > { %v510_v63 = vadd.f32 %v1631_v25, %v509_v62 }
 0x111   : > { %v539_v1 = vmax.f32 %v510_v63, 0.0 }
 0x113   : > { %v551_v2 = vpack.c.bf16 %v539_v1, %v538_v0 }
 0x115   : > { %647 = vmatmul.bf16.gmra.mxu1 %v551_v2 }
 0x116   : > { %v512_v4 = vpop.f32.mrf.mxu0 }
 0x117   : > { %v513_v7 = vadd.f32 %v1631_v25, %v512_v4 }
 0x119   : > { %v540_v11 = vmax.f32 %v513_v7, 0.0 }
 0x11e   : > { %v514_v8 = vpop.f32.mrf.mxu0 }
 0x11f   : > { %v515_v9 = vadd.f32 %v1631_v25, %v514_v8 }
 0x121   : > { %v541_v12 = vmax.f32 %v515_v9, 0.0 }
 0x123   : > { %v552_v13 = vpack.c.bf16 %v541_v12, %v540_v11 }
 0x125   : > { %652 = vmatmul.bf16.gmra.mxu1 %v552_v13 }
 0x126   : > { %v517_v14 = vpop.f32.mrf.mxu0 }
 0x127   : > { %v518_v15 = vadd.f32 %v1631_v25, %v517_v14 }
 0x129   : > { %v542_v18 = vmax.f32 %v518_v15, 0.0 }
 0x12e   : > { %v519_v16 = vpop.f32.mrf.mxu0 }
 0x12f   : > { %v520_v17 = vadd.f32 %v1631_v25, %v519_v16  ;;  %v1236_v25 = vld [vmem:[%s1712_s4] ss:$0 sm:$0xff] }
 0x131   : > { %v543_v19 = vmax.f32 %v520_v17, 0.0 }
 0x133   : > { %v553_v20 = vpack.c.bf16 %v543_v19, %v542_v18  ;;  %v1237_v18 = vld [vmem:[%s1714_s6] ss:$0 sm:$0xff] }
 0x135   : > { %657 = vmatmul.bf16.gmra.mxu1 %v553_v20 }
 0x162   : > { %v633_v26 = vpop.f32.mrf.mxu1 }
 0x163   : > { %v634_v27 = vadd.f32 %v1236_v25, %v633_v26 }
 0x165   : > { %v673_v30 = vmax.f32 %v634_v27, 0.0 }
 0x16a   : > { %v635_v28 = vpop.f32.mrf.mxu1 }
 0x16b   : > { %v636_v29 = vadd.f32 %v1236_v25, %v635_v28 }
 0x16d   : > { %v674_v31 = vmax.f32 %v636_v29, 0.0 }
 0x16e   : > { %v663_v32 = vpop.f32.mrf.mxu3 }
 0x16f   : > { %v689_v33 = vpack.c.bf16 %v674_v31, %v673_v30  ;;  %v664_v35 = vadd.f32 %v1236_v25, %v663_v32 }
 0x171   : > { %773 = vmatmul.bf16.vlgmr.msra.gmra.mxu2 %v689_v33  ;;  %v685_v37 = vmax.f32 %v664_v35, 0.0 }
 0x172   : > { %v638_v34 = vpop.f32.mrf.mxu1 }
 0x173   : > { %v639_v39 = vadd.f32 %v1236_v25, %v638_v34 }
 0x175   : > { %v675_v44 = vmax.f32 %v639_v39, 0.0 }
 0x176   : > { %v665_v36 = vpop.f32.mrf.mxu3 }
 0x177   : > { %v666_v38 = vadd.f32 %v1236_v25, %v665_v36 }
 0x179   : > { %v686_v40 = vmax.f32 %v666_v38, 0.0 }
 0x17a   : > { %v640_v41 = vpop.f32.mrf.mxu1 }
 0x17b   : > { %v641_v42 = vadd.f32 %v1236_v25, %v640_v41  ;;  %v695_v43 = vpack.c.bf16 %v686_v40, %v685_v37 }
 0x17d   : > { %v676_v45 = vmax.f32 %v641_v42, 0.0  ;;  %803 = vmatmul.bf16.vlgmr.msra.gmra.mxu3 %v695_v43 }
 0x17e   : > { %v668_v46 = vpop.f32.mrf.mxu3 }
 0x17f   : > { %v690_v47 = vpack.c.bf16 %v676_v45, %v675_v44  ;;  %v669_v49 = vadd.f32 %v1236_v25, %v668_v46 }
 0x181   : > { %778 = vmatmul.bf16.gmra.mxu2 %v690_v47  ;;  %v687_v51 = vmax.f32 %v669_v49, 0.0 }
 0x182   : > { %v643_v48 = vpop.f32.mrf.mxu1 }
 0x183   : > { %v644_v53 = vadd.f32 %v1236_v25, %v643_v48 }
 0x185   : > { %v677_v58 = vmax.f32 %v644_v53, 0.0 }
 0x186   : > { %v670_v50 = vpop.f32.mrf.mxu3 }
 0x187   : > { %v671_v52 = vadd.f32 %v1236_v25, %v670_v50 }
 0x189   : > { %v688_v54 = vmax.f32 %v671_v52, 0.0 }
 0x18a   : > { %v645_v55 = vpop.f32.mrf.mxu1 }
 0x18b   : > { %v646_v56 = vadd.f32 %v1236_v25, %v645_v55  ;;  %v696_v57 = vpack.c.bf16 %v688_v54, %v687_v51 }
 0x18d   : > { %v678_v59 = vmax.f32 %v646_v56, 0.0  ;;  %808 = vmatmul.bf16.gmra.mxu3 %v696_v57 }
 0x18f   : > { %v691_v60 = vpack.c.bf16 %v678_v59, %v677_v58 }
 0x191   : > { %783 = vmatmul.bf16.gmra.mxu2 %v691_v60 }
 0x192   : > { %v648_v61 = vpop.f32.mrf.mxu1 }
 0x193   : > { %v649_v62 = vadd.f32 %v1236_v25, %v648_v61 }
 0x195   : > { %v679_v1 = vmax.f32 %v649_v62, 0.0 }
 0x19a   : > { %v650_v63 = vpop.f32.mrf.mxu1 }
 0x19b   : > { %v651_v0 = vadd.f32 %v1236_v25, %v650_v63 }
 0x19d   : > { %v680_v2 = vmax.f32 %v651_v0, 0.0 }
 0x19f   : > { %v692_v3 = vpack.c.bf16 %v680_v2, %v679_v1 }
 0x1a1   : > { %788 = vmatmul.bf16.gmra.mxu2 %v692_v3 }
 0x1a2   : > { %v653_v4 = vpop.f32.mrf.mxu1 }
 0x1a3   : > { %v654_v5 = vadd.f32 %v1236_v25, %v653_v4 }
 0x1a5   : > { %v681_v8 = vmax.f32 %v654_v5, 0.0 }
 0x1aa   : > { %v655_v6 = vpop.f32.mrf.mxu1 }
 0x1ab   : > { %v656_v7 = vadd.f32 %v1236_v25, %v655_v6 }
 0x1ad   : > { %v682_v9 = vmax.f32 %v656_v7, 0.0 }
 0x1af   : > { %v693_v10 = vpack.c.bf16 %v682_v9, %v681_v8 }
 0x1b1   : > { %793 = vmatmul.bf16.gmra.mxu2 %v693_v10 }
 0x1b2   : > { %v658_v11 = vpop.f32.mrf.mxu1 }
 0x1b3   : > { %v659_v12 = vadd.f32 %v1236_v25, %v658_v11 }
 0x1b5   : > { %v683_v15 = vmax.f32 %v659_v12, 0.0 }
 0x1ba   : > { %v660_v13 = vpop.f32.mrf.mxu1 }
 0x1bb   : > { %v661_v14 = vadd.f32 %v1236_v25, %v660_v13 }
 0x1bd   : > { %v684_v16 = vmax.f32 %v661_v14, 0.0 }
 0x1bf   : > { %v694_v17 = vpack.c.bf16 %v684_v16, %v683_v15 }
 0x1c1   : > { %798 = vmatmul.bf16.gmra.mxu2 %v694_v17 }
 0x1f4   : > { %v774_v19 = vpop.f32.mrf.mxu2 }
 0x1f5   : > { %v775_v20 = vadd.f32 %v1237_v18, %v774_v19 }
 0x1f7   : > { %814 = vst [vmem:[%s1656_s29] sm:$0xff] %v775_v20 }
 0x1fc   : > { %v776_v21 = vpop.f32.mrf.mxu2 }
 0x1fd   : > { %v777_v22 = vadd.f32 %v1237_v18, %v776_v21 }
 0x1ff   : > { %815 = vst [vmem:[%s1656_s29 + $0x8] sm:$0xff] %v777_v22 }
 0x200   : > { %v804_v23 = vpop.f32.mrf.mxu3 }
 0x201   : > { %v805_v24 = vadd.f32 %v1237_v18, %v804_v23 }
 0x203   : > { %826 = vst [vmem:[%s1656_s29 + $0x60] sm:$0xff] %v805_v24 }
 0x204   : > { %v779_v26 = vpop.f32.mrf.mxu2 }
 0x205   : > { %v780_v25 = vadd.f32 %v1237_v18, %v779_v26 }
 0x207   : > { %816 = vst [vmem:[%s1656_s29 + $0x10] sm:$0xff] %v780_v25 }
 0x208   : > { %v806_v27 = vpop.f32.mrf.mxu3 }
 0x209   : > { %v807_v28 = vadd.f32 %v1237_v18, %v806_v27 }
 0x20b   : > { %827 = vst [vmem:[%s1656_s29 + $0x68] sm:$0xff] %v807_v28 }
 0x20c   : > { %v781_v29 = vpop.f32.mrf.mxu2 }
 0x20d   : > { %v782_v30 = vadd.f32 %v1237_v18, %v781_v29 }
 0x20f   : > { %817 = vst [vmem:[%s1656_s29 + $0x18] sm:$0xff] %v782_v30 }
 0x210   : > { %v809_v31 = vpop.f32.mrf.mxu3 }
 0x211   : > { %v810_v32 = vadd.f32 %v1237_v18, %v809_v31 }
 0x213   : > { %828 = vst [vmem:[%s1656_s29 + $0x70] sm:$0xff] %v810_v32 }
 0x214   : > { %v784_v33 = vpop.f32.mrf.mxu2 }
 0x215   : > { %v785_v34 = vadd.f32 %v1237_v18, %v784_v33 }
 0x217   : > { %818 = vst [vmem:[%s1656_s29 + $0x20] sm:$0xff] %v785_v34 }
 0x218   : > { %v811_v35 = vpop.f32.mrf.mxu3 }
 0x219   : > { %v812_v36 = vadd.f32 %v1237_v18, %v811_v35 }
 0x21b   : > { %829 = vst [vmem:[%s1656_s29 + $0x78] sm:$0xff] %v812_v36 }
 0x21c   : > { %v786_v37 = vpop.f32.mrf.mxu2 }
 0x21d   : > { %v787_v38 = vadd.f32 %v1237_v18, %v786_v37 }
 0x21f   : > { %819 = vst [vmem:[%s1656_s29 + $0x28] sm:$0xff] %v787_v38 }
 0x224   : > { %v789_v39 = vpop.f32.mrf.mxu2 }
 0x225   : > { %v790_v40 = vadd.f32 %v1237_v18, %v789_v39 }
 0x227   : > { %820 = vst [vmem:[%s1656_s29 + $0x30] sm:$0xff] %v790_v40 }
 0x22c   : > { %v791_v41 = vpop.f32.mrf.mxu2 }
 0x22d   : > { %v792_v42 = vadd.f32 %v1237_v18, %v791_v41 }
 0x22f   : > { %821 = vst [vmem:[%s1656_s29 + $0x38] sm:$0xff] %v792_v42 }
 0x234   : > { %v794_v43 = vpop.f32.mrf.mxu2 }
 0x235   : > { %v795_v44 = vadd.f32 %v1237_v18, %v794_v43 }
 0x237   : > { %822 = vst [vmem:[%s1656_s29 + $0x40] sm:$0xff] %v795_v44 }
 0x23c   : > { %v796_v45 = vpop.f32.mrf.mxu2 }
 0x23d   : > { %v797_v46 = vadd.f32 %v1237_v18, %v796_v45 }
 0x23f   : > { %823 = vst [vmem:[%s1656_s29 + $0x48] sm:$0xff] %v797_v46 }
 0x244   : > { %v799_v47 = vpop.f32.mrf.mxu2 }
 0x245   : > { %v800_v48 = vadd.f32 %v1237_v18, %v799_v47 }
 0x247   : > { %824 = vst [vmem:[%s1656_s29 + $0x50] sm:$0xff] %v800_v48 }
 0x24c   : > { %v801_v49 = vpop.f32.mrf.mxu2 }
 0x24d   : > { %v802_v50 = vadd.f32 %v1237_v18, %v801_v49 }
 0x24f   : > { %825 = vst [vmem:[%s1656_s29 + $0x58] sm:$0xff] %v802_v50 }
 0x250   : > { %1385 = shalt.err (!%p1382_p10)
}
 0x251   : > { %s1439_s15 = smov 128   ;;  %s1440_s29 = smov 8  }
 0x252   : > { %1168 = dma.vmem_to_hbm [thread:$0]  (%p1572_p3), %s844_s1, 2048, %s846_s23, %s831_s30, %s1439_s15, %s1439_s15, %s1440_s29  }
 0x253 PF: > { %s860_s9 = sand.u32 1, %s1420_s24   ;;  %p1728_p12 = scmp.ge.s32.totalorder %s1432_s27, 2 }
 0x254   : > { %s861_s21 = scalar_lea.sflag [#allocation4], %s860_s9 }
 0x255   : > { %p1185_p13 = pnand %p1728_p12, %p1516_p6 }
 0x257   : > { %p1186_p0 = pneg %p1185_p13 }
 0x259   : > { %1415 = dma.done.wait (%p1186_p0), %s861_s21, 2048  }
 0x25a   : > { %1417 = vsyncadd (%p1186_p0), %s861_s21, 4294965248  ;;  %p22_p5 = scmp.ge.s32.totalorder %s1554_s13, 4   ;;  %s1729_s24 = smov %s1424_s25 }
 0x25b   : > { %s1730_s25 = smov %s1428_s26  ;;  %s1731_s26 = smov %s1568_s17 }
 0x25c   : > { %s1732_s27 = smov %s1554_s13  ;;  %24 = sbr.rel (!%p22_p5) target bundleno = 9 (0x9), region = 105 }
 0x261   :  { %867 = vsyncpa [#allocation3], 1 }
 0x262   :  { %869 = vsyncpa [#allocation3 + $0x1], 1 }
 0x263   :  { %870 = vsyncpa [#allocation6], 1 }
 0x264   :  { %871 = vsyncpa [#allocation9], 1 }
 0x265   :  { %872 = vsyncpa [#allocation4], 1 }
 0x266   :  { %874 = vsyncpa [#allocation4 + $0x1], 1 }

</bundles_post_ra>
